<compile_context>
chip_gen: v7x
topology: tpu7x:2x2x1
jax: 0.10.0
libtpu: 0.0.40
codegen_flags: <defaults>
</compile_context>

<pallas_src>
import jax
import jax.numpy as jnp
import numpy as np
from jax import lax
from jax.experimental import pallas as pl
from jax.experimental.pallas import tpu as pltpu

KSIZE = 7
PAD = KSIZE // 2


def _round_up(x, m):
    return ((x + m - 1) // m) * m


def _toeplitz_conv_matrices(conv_weight, H, W):
    """Fold the whole 7x7 'same' conv (kh, kw shifts and zero padding) into
    two dense matrices T[ci] in R^{(H*W) x (H*W)} such that
        out_flat = feat0_flat @ T[0] + feat1_flat @ T[1]
    reproduces conv2d(cat([feat0, feat1], 1), W, padding=3, bias=False)."""
    wgt = jnp.asarray(conv_weight, jnp.float32).reshape(2, KSIZE, KSIZE)
    hp = jnp.arange(H)   # input row  h'
    wp = jnp.arange(W)   # input col  w'
    ho = jnp.arange(H)   # output row h
    wo = jnp.arange(W)   # output col w
    kh = hp[:, None, None, None] - ho[None, None, :, None] + PAD   # (H,1,H,1)
    kw = wp[None, :, None, None] - wo[None, None, None, :] + PAD   # (1,W,1,W)
    valid = (kh >= 0) & (kh < KSIZE) & (kw >= 0) & (kw < KSIZE)    # (H,W,H,W)
    kh_c = jnp.clip(kh, 0, KSIZE - 1)
    kw_c = jnp.clip(kw, 0, KSIZE - 1)
    t = wgt[:, kh_c, kw_c]                                         # (2,H,W,H,W)
    t = jnp.where(valid[None], t, 0.0)
    return t.reshape(2, H * W, H * W)


def _pick_channel_chunk(C, cap=32):
    """Channel block size: full C when small; otherwise a divisor of C that is
    a multiple of 8 (sublane tiling rule) and <= cap."""
    if C <= cap:
        return C
    cands = [d for d in range(8, cap + 1, 8) if C % d == 0]
    return max(cands) if cands else C   # fallback: fully resident channels


def _pick_batch_block(N, bytes_per_elem, *, target_bytes,
                      min_pipeline_steps=4, min_block_bytes=1 << 20):
    """Largest divisor of N whose (single-buffered) input block fits
    target_bytes.  Prefer enough grid steps for DMA/compute pipelining (and to
    feed both v7x TensorCores), but never below ~1 MiB per block."""
    divisors = [d for d in range(1, N + 1) if N % d == 0]
    fitting = [d for d in divisors if d * bytes_per_elem <= target_bytes] or [1]
    pipelined = [d for d in fitting
                 if N // d >= min_pipeline_steps
                 and d * bytes_per_elem >= min_block_bytes]
    return max(pipelined) if pipelined else max(fitting)


def _make_kernel(C, Cc, HW, Nb):
    inv_c = np.float32(1.0 / C)

    def spatial_attention_kernel(x_ref, t_ref, o_ref, sum_ref, max_ref):
        # x_ref:   (Nb, Cc, HW)  lane-dense input block (one channel chunk)
        # t_ref:   (2, HW, HW)   Toeplitz conv matrices (grid-invariant)
        # o_ref:   (Nb, 1, HW)   lane-dense output block
        # sum/max: (Nb, HW)      f32 channel-reduction accumulators (scratch)
        c_step = pl.program_id(1)

        @pl.when(c_step == 0)
        def _():
            sum_ref[...] = jnp.zeros_like(sum_ref)
            max_ref[...] = jnp.full_like(max_ref, -jnp.inf)

        # Fused single-pass sum + max over this channel chunk.
        s = sum_ref[...]
        m = max_ref[...]
        for c in range(Cc):                       # bounded unroll (Cc <= 32)
            xc = x_ref[:, c, :].astype(jnp.float32)
            s = s + xc
            m = jnp.maximum(m, xc)
        sum_ref[...] = s
        max_ref[...] = m

        # Finalize on the last channel step: conv (two lane-dense MXU matmuls)
        # + sigmoid + lane-dense store.
        @pl.when(c_step == pl.num_programs(1) - 1)
        def _():
            mean = sum_ref[...] * inv_c
            y = (jnp.dot(mean, t_ref[0], preferred_element_type=jnp.float32) +
                 jnp.dot(max_ref[...], t_ref[1],
                         preferred_element_type=jnp.float32))
            o_ref[...] = jax.nn.sigmoid(y).reshape(Nb, 1, HW).astype(o_ref.dtype)

    return spatial_attention_kernel


def spatial_attention(x, conv_weight, *, target_block_bytes=8 << 20):
    """x: (N, C, H, W) float32; conv_weight: (1, 2, 7, 7) float32."""
    N, C, H, W = x.shape
    HW = H * W
    x_flat = x.reshape(N, C, HW)                       # free, contiguous
    t_mats = _toeplitz_conv_matrices(conv_weight, H, W)  # (2, HW, HW)

    Cc = _pick_channel_chunk(C)
    hw_pad = _round_up(HW, 128)                        # lane padding
    cc_pad = _round_up(Cc, 8)                          # sublane padding (f32)
    bytes_per_batch_elem = cc_pad * hw_pad * 4
    Nb = _pick_batch_block(N, bytes_per_batch_elem,
                           target_bytes=target_block_bytes)

    # True VMEM accounting: double-buffered BlockSpec operands + scratch.
    in_block = Nb * bytes_per_batch_elem
    t_block = 2 * _round_up(HW, 8) * hw_pad * 4
    out_block = Nb * 8 * hw_pad * 4
    scratch = 2 * _round_up(Nb, 8) * hw_pad * 4
    vmem_needed = 2 * (in_block + t_block + out_block) + scratch
    vmem_limit = int(max(vmem_needed + (8 << 20), 16 << 20))

    kernel = _make_kernel(C, Cc, HW, Nb)
    out = pl.pallas_call(
        kernel,
        out_shape=jax.ShapeDtypeStruct((N, 1, HW), jnp.float32),
        grid_spec=pltpu.PrefetchScalarGridSpec(
            num_scalar_prefetch=0,
            grid=(N // Nb, C // Cc),                   # reduction axis last
            in_specs=[
                pl.BlockSpec((Nb, Cc, HW), lambda n, c: (n, c, 0)),
                pl.BlockSpec((2, HW, HW), lambda n, c: (0, 0, 0)),
            ],
            out_specs=pl.BlockSpec((Nb, 1, HW), lambda n, c: (n, 0, 0)),
            scratch_shapes=[
                pltpu.VMEM((Nb, HW), jnp.float32),     # channel-sum accumulator
                pltpu.VMEM((Nb, HW), jnp.float32),     # channel-max accumulator
            ],
        ),
        compiler_params=pltpu.CompilerParams(
            dimension_semantics=("parallel", "arbitrary"),
            vmem_limit_bytes=vmem_limit,
        ),
    )(x_flat, t_mats)
    return out.reshape(N, 1, H, W)


def spatial_attention_ref(x, conv_weight):
    """Pure-JAX reference matching the PyTorch module."""
    avg = jnp.mean(x, axis=1, keepdims=True)
    mx = jnp.max(x, axis=1, keepdims=True)
    feat = jnp.concatenate([avg, mx], axis=1)          # (N, 2, H, W)
    y = lax.conv_general_dilated(
        feat, conv_weight,
        window_strides=(1, 1),
        padding=((PAD, PAD), (PAD, PAD)),
        dimension_numbers=("NCHW", "OIHW", "NCHW"),
    )
    return jax.nn.sigmoid(y)


if __name__ == "__main__":
    key = jax.random.PRNGKey(0)
    kx1, kw1, kx2, kw2 = jax.random.split(key, 4)

    # Small CBAM-style case (single channel chunk).
    N, C, H, W = 2, 4, 16, 16
    x = jax.random.normal(kx1, (N, C, H, W), dtype=jnp.float32)
    conv_weight = (jax.random.normal(kw1, (1, 2, KSIZE, KSIZE),
                                     dtype=jnp.float32)
                   * (1.0 / np.sqrt(2 * KSIZE * KSIZE)))
    out = jax.block_until_ready(spatial_attention(x, conv_weight))
    ref = jax.block_until_ready(spatial_attention_ref(x, conv_weight))
    np.testing.assert_allclose(np.asarray(out), np.asarray(ref),
                               rtol=1e-4, atol=1e-5)

    # Exercise the multi-step channel-chunk reduction path (C > chunk cap).
    N2, C2 = 2, 64
    x2 = jax.random.normal(kx2, (N2, C2, H, W), dtype=jnp.float32)
    conv_weight2 = (jax.random.normal(kw2, (1, 2, KSIZE, KSIZE),
                                      dtype=jnp.float32)
                    * (1.0 / np.sqrt(2 * KSIZE * KSIZE)))
    out2 = jax.block_until_ready(spatial_attention(x2, conv_weight2))
    ref2 = jax.block_until_ready(spatial_attention_ref(x2, conv_weight2))
    np.testing.assert_allclose(np.asarray(out2), np.asarray(ref2),
                               rtol=1e-4, atol=1e-5)

    print("KERNEL_OK")
</pallas_src>

<mosaic_0001>
module attributes {stable_mosaic.version = 11 : i64} {
  func.func @spatial_attention_kernel(%arg0: i32, %arg1: i32, %arg2: memref<2x4x256xf32, #tpu.memory_space<vmem>>, %arg3: memref<2x256x256xf32, #tpu.memory_space<vmem>>, %arg4: memref<2x1x256xf32, #tpu.memory_space<vmem>>, %arg5: memref<2x256xf32, #tpu.memory_space<vmem>>, %arg6: memref<2x256xf32, #tpu.memory_space<vmem>>) attributes {dimension_semantics = [#tpu.dimension_semantics<parallel>, #tpu.dimension_semantics<arbitrary>], iteration_bounds = array<i64: 1, 1>, scalar_prefetch = 0 : i64, scratch_operands = 2 : i64, tpu.core_type = #tpu.core_type<tc>, window_params = [{transform_indices = @transform_0, window_bounds = array<i64: 2, 4, 256>}, {pipeline_mode = #tpu.pipeline_mode<synchronous>, transform_indices = @transform_1, window_bounds = array<i64: 2, 256, 256>}, {transform_indices = @transform_2, window_bounds = array<i64: 2, 1, 256>}]} {
    %c0_i32 = arith.constant 0 : i32
    %0 = arith.cmpi eq, %arg1, %c0_i32 : i32
    %1 = arith.extui %0 : i1 to i32
    %c0_i32_0 = arith.constant 0 : i32
    %2 = arith.cmpi ne, %1, %c0_i32_0 : i32
    scf.if %2 {
      %cst = arith.constant 0.000000e+00 : f32
      %26 = vector.broadcast %cst : f32 to vector<2x256xf32>
      %c0_19 = arith.constant 0 : index
      %c0_20 = arith.constant 0 : index
      %27 = vector.load %arg5[%c0_19, %c0_20] : memref<2x256xf32, #tpu.memory_space<vmem>>, vector<2x256xf32>
      tpu.vector_store %arg5[%c0_19, %c0_20], %26 {strides = array<i32>} : memref<2x256xf32, #tpu.memory_space<vmem>>, vector<2x256xf32>,
      %cst_21 = arith.constant 0xFF800000 : f32
      %28 = vector.broadcast %cst_21 : f32 to vector<2x256xf32>
      %c0_22 = arith.constant 0 : index
      %c0_23 = arith.constant 0 : index
      %29 = vector.load %arg6[%c0_22, %c0_23] : memref<2x256xf32, #tpu.memory_space<vmem>>, vector<2x256xf32>
      tpu.vector_store %arg6[%c0_22, %c0_23], %28 {strides = array<i32>} : memref<2x256xf32, #tpu.memory_space<vmem>>, vector<2x256xf32>,
    } else {
    }
    %c0 = arith.constant 0 : index
    %c0_1 = arith.constant 0 : index
    %3 = vector.load %arg5[%c0, %c0_1] : memref<2x256xf32, #tpu.memory_space<vmem>>, vector<2x256xf32>
    %c0_2 = arith.constant 0 : index
    %c0_3 = arith.constant 0 : index
    %4 = vector.load %arg6[%c0_2, %c0_3] : memref<2x256xf32, #tpu.memory_space<vmem>>, vector<2x256xf32>
    %c0_4 = arith.constant 0 : index
    %c0_5 = arith.constant 0 : index
    %c0_6 = arith.constant 0 : index
    %5 = vector.load %arg2[%c0_4, %c0_5, %c0_6] : memref<2x4x256xf32, #tpu.memory_space<vmem>>, vector<2x1x256xf32>
    %6 = vector.shape_cast %5 : vector<2x1x256xf32> to vector<2x256xf32>
    %7 = arith.addf %3, %6 : vector<2x256xf32>
    %8 = arith.maximumf %4, %6 : vector<2x256xf32>
    %c0_7 = arith.constant 0 : index
    %c1 = arith.constant 1 : index
    %c0_8 = arith.constant 0 : index
    %9 = vector.load %arg2[%c0_7, %c1, %c0_8] : memref<2x4x256xf32, #tpu.memory_space<vmem>>, vector<2x1x256xf32>
    %10 = vector.shape_cast %9 : vector<2x1x256xf32> to vector<2x256xf32>
    %11 = arith.addf %7, %10 : vector<2x256xf32>
    %12 = arith.maximumf %8, %10 : vector<2x256xf32>
    %c0_9 = arith.constant 0 : index
    %c2 = arith.constant 2 : index
    %c0_10 = arith.constant 0 : index
    %13 = vector.load %arg2[%c0_9, %c2, %c0_10] : memref<2x4x256xf32, #tpu.memory_space<vmem>>, vector<2x1x256xf32>
    %14 = vector.shape_cast %13 : vector<2x1x256xf32> to vector<2x256xf32>
    %15 = arith.addf %11, %14 : vector<2x256xf32>
    %16 = arith.maximumf %12, %14 : vector<2x256xf32>
    %c0_11 = arith.constant 0 : index
    %c3 = arith.constant 3 : index
    %c0_12 = arith.constant 0 : index
    %17 = vector.load %arg2[%c0_11, %c3, %c0_12] : memref<2x4x256xf32, #tpu.memory_space<vmem>>, vector<2x1x256xf32>
    %18 = vector.shape_cast %17 : vector<2x1x256xf32> to vector<2x256xf32>
    %19 = arith.addf %15, %18 : vector<2x256xf32>
    %20 = arith.maximumf %16, %18 : vector<2x256xf32>
    %c0_13 = arith.constant 0 : index
    %c0_14 = arith.constant 0 : index
    %21 = vector.load %arg5[%c0_13, %c0_14] : memref<2x256xf32, #tpu.memory_space<vmem>>, vector<2x256xf32>
    tpu.vector_store %arg5[%c0_13, %c0_14], %19 {strides = array<i32>} : memref<2x256xf32, #tpu.memory_space<vmem>>, vector<2x256xf32>,
    %c0_15 = arith.constant 0 : index
    %c0_16 = arith.constant 0 : index
    %22 = vector.load %arg6[%c0_15, %c0_16] : memref<2x256xf32, #tpu.memory_space<vmem>>, vector<2x256xf32>
    tpu.vector_store %arg6[%c0_15, %c0_16], %20 {strides = array<i32>} : memref<2x256xf32, #tpu.memory_space<vmem>>, vector<2x256xf32>,
    %c0_i32_17 = arith.constant 0 : i32
    %23 = arith.cmpi eq, %arg1, %c0_i32_17 : i32
    %24 = arith.extui %23 : i1 to i32
    %c0_i32_18 = arith.constant 0 : i32
    %25 = arith.cmpi ne, %24, %c0_i32_18 : i32
    scf.if %25 {
      %c0_19 = arith.constant 0 : index
      %c0_20 = arith.constant 0 : index
      %26 = vector.load %arg5[%c0_19, %c0_20] : memref<2x256xf32, #tpu.memory_space<vmem>>, vector<2x256xf32>
      %cst = arith.constant 2.500000e-01 : f32
      %27 = vector.broadcast %cst : f32 to vector<2x256xf32>
      %28 = arith.mulf %26, %27 : vector<2x256xf32>
      %c0_21 = arith.constant 0 : index
      %c0_22 = arith.constant 0 : index
      %c0_23 = arith.constant 0 : index
      %29 = vector.load %arg3[%c0_21, %c0_22, %c0_23] : memref<2x256x256xf32, #tpu.memory_space<vmem>>, vector<1x256x256xf32>
      %30 = vector.shape_cast %29 : vector<1x256x256xf32> to vector<256x256xf32>
      %cst_24 = arith.constant dense<0.000000e+00> : vector<2x256xf32>
      %31 = tpu.matmul %28, %30, %cst_24 {dimension_numbers = #tpu.dot_dimension_numbers<[1], [0], [0], [1], [0, 0, 1, 1], [], []>} : vector<2x256xf32>, vector<256x256xf32>, vector<2x256xf32> -> vector<2x256xf32>
      %c0_25 = arith.constant 0 : index
      %c0_26 = arith.constant 0 : index
      %32 = vector.load %arg6[%c0_25, %c0_26] : memref<2x256xf32, #tpu.memory_space<vmem>>, vector<2x256xf32>
      %c1_27 = arith.constant 1 : index
      %c0_28 = arith.constant 0 : index
      %c0_29 = arith.constant 0 : index
      %33 = vector.load %arg3[%c1_27, %c0_28, %c0_29] : memref<2x256x256xf32, #tpu.memory_space<vmem>>, vector<1x256x256xf32>
      %34 = vector.shape_cast %33 : vector<1x256x256xf32> to vector<256x256xf32>
      %cst_30 = arith.constant dense<0.000000e+00> : vector<2x256xf32>
      %35 = tpu.matmul %32, %34, %cst_30 {dimension_numbers = #tpu.dot_dimension_numbers<[1], [0], [0], [1], [0, 0, 1, 1], [], []>} : vector<2x256xf32>, vector<256x256xf32>, vector<2x256xf32> -> vector<2x256xf32>
      %36 = arith.addf %31, %35 : vector<2x256xf32>
      %37 = arith.negf %36 : vector<2x256xf32>
      %38 = math.exp %37 : vector<2x256xf32>
      %cst_31 = arith.constant 1.000000e+00 : f32
      %39 = vector.broadcast %cst_31 : f32 to vector<2x256xf32>
      %40 = arith.addf %39, %38 : vector<2x256xf32>
      %41 = arith.divf %39, %40 : vector<2x256xf32>
      %42 = vector.shape_cast %41 : vector<2x256xf32> to vector<2x1x256xf32>
      %c0_32 = arith.constant 0 : index
      %c0_33 = arith.constant 0 : index
      %c0_34 = arith.constant 0 : index
      %43 = vector.load %arg4[%c0_32, %c0_33, %c0_34] : memref<2x1x256xf32, #tpu.memory_space<vmem>>, vector<2x1x256xf32>
      tpu.vector_store %arg4[%c0_32, %c0_33, %c0_34], %42 {strides = array<i32>} : memref<2x1x256xf32, #tpu.memory_space<vmem>>, vector<2x1x256xf32>,
    } else {
    }
    return
  }
  func.func @transform_0(%arg0: i32, %arg1: i32) -> (i32, i32, i32) {
    %c0_i32 = arith.constant 0 : i32
    %c0_i32_0 = arith.constant 0 : i32
    return %arg0, %arg1, %c0_i32 : i32, i32, i32
  }
  func.func @transform_1(%arg0: i32, %arg1: i32) -> (i32, i32, i32) {
    %c0_i32 = arith.constant 0 : i32
    %c0_i32_0 = arith.constant 0 : i32
    %c0_i32_1 = arith.constant 0 : i32
    %c0_i32_2 = arith.constant 0 : i32
    return %c0_i32, %c0_i32_0, %c0_i32_1 : i32, i32, i32
  }
  func.func @transform_2(%arg0: i32, %arg1: i32) -> (i32, i32, i32) {
    %c0_i32 = arith.constant 0 : i32
    %c0_i32_0 = arith.constant 0 : i32
    %c0_i32_1 = arith.constant 0 : i32
    return %arg0, %c0_i32, %c0_i32_0 : i32, i32, i32
  }
}

</mosaic_0001>

<bundles_post_ra>
// kernel: tpu_custom_call.1
= control target key start
LH: loop header
LB: loop body
LE: loop exit
PB: predicated region body
PF: predicated region fallthrough
CT: control target
= control target key end

     0   :  { %7 = vsyncpa [#allocation5], 0  ;;  %s778_s0 = inlined_call_operand.hbm [shape: f32[2,4,256], index: 0, kind: input, shape index: {}]   ;;  %s779_s1 = inlined_call_operand.hbm [shape: f32[2,256,256], index: 1, kind: input, shape index: {}]   ;;  %s780_s2 = inlined_call_operand.hbm [shape: f32[2,1,256], index: 2, kind: output, shape index: {}]  }
   0x1   :  { %8 = vsyncpa [#allocation8], 0 }
   0x2   :  { %9 = vsyncpa [#allocation6], 0  ;;  %s706_s9 = smov [#allocation4]   ;;  %s634_s13 = scalar_lea.hbm %s778_s0, 256 }
   0x3   :  { %s15_s10 = sshll.u32 %s706_s9, 4  ;;  %p635_p0 = scmp.ne.s32.totalorder %s778_s0, %s634_s13  ;;  %s16_s10 = int_to_ptr.vmem [resolvable:$true] %s15_s10 }
   0x4   :  { %p638_p1 = scmp.lt.u32.totalorder %s634_s13, %s778_s0 }
   0x6   :  { %p640_p2 = pnand %p638_p1, %p635_p0 }
   0x8   :  { %643 = shalt.err (!%p640_p2)
}
   0x9   :  { %s644_s18 = scalar_lea.vmem %s16_s10, 256  ;;  %p649_p4 = scmp.lt.s32.totalorder %s16_s10, %s16_s10 }
   0xa   :  { %p645_p3 = scmp.ne.s32.totalorder %s16_s10, %s644_s18  ;;  %p650_p5 = scmp.lt.s32.totalorder %s644_s18, %s644_s18 }
   0xc   :  { %p651_p6 = por %p650_p5, %p649_p4 }
   0xe   :  { %p652_p7 = pnand %p651_p6, %p645_p3 }
  0x10   :  { %655 = shalt.err (!%p652_p7)
}
  0x11   :  { %s707_s19 = smov 128   ;;  %s708_s20 = smov 8  }
  0x12   :  { %21 = dma.hbm_to_vmem [thread:$0]  %s778_s0, 256, %s16_s10, [#allocation5], %s707_s19, %s707_s19, %s708_s20  }
  0x13   :  { %s709_s23 = smov [#allocation7]   ;;  %s656_s27 = scalar_lea.hbm %s779_s1, 16384 }
  0x14   :  { %s27_s24 = sshll.u32 %s709_s23, 4  ;;  %p657_p8 = scmp.ne.s32.totalorder %s779_s1, %s656_s27  ;;  %s28_s24 = int_to_ptr.vmem [resolvable:$true] %s27_s24 }
  0x15   :  { %p660_p9 = scmp.lt.u32.totalorder %s656_s27, %s779_s1 }
  0x17   :  { %p662_p10 = pnand %p660_p9, %p657_p8 }
  0x19   :  { %665 = shalt.err (!%p662_p10)
}
  0x1a   :  { %s666_s4 = scalar_lea.vmem %s28_s24, 16384  ;;  %p671_p12 = scmp.lt.s32.totalorder %s28_s24, %s28_s24 }
  0x1b   :  { %p667_p11 = scmp.ne.s32.totalorder %s28_s24, %s666_s4  ;;  %p672_p13 = scmp.lt.s32.totalorder %s666_s4, %s666_s4 }
  0x1d   :  { %p673_p0 = por %p672_p13, %p671_p12 }
  0x1f   :  { %p674_p1 = pnand %p673_p0, %p667_p11 }
  0x21   :  { %677 = shalt.err (!%p674_p1)
}
  0x22   :  { %s710_s0 = smov 256   ;;  %s711_s5 = smov 16  }
  0x23   :  { %33 = dma.hbm_to_vmem [thread:$0]  %s779_s1, 16384, %s28_s24, [#allocation8], %s710_s0, %s710_s0, %s711_s5  }
  0x24   :  { %700 = dma.done.wait [#allocation5], 256  }
  0x25   :  { %701 = vsyncadd [#allocation5], 4294967040 }
  0x26   :  { %702 = dma.done.wait [#allocation8], 16384  }
  0x27   :  { %703 = vsyncadd [#allocation8], 4294950912  ;;  %v712_v0 = vmov -inf   ;;  %v713_v1 = vmov 0.0   ;;  %v189_v2 = vld [vmem:[#allocation7 + $0x208] sm:$0xff]  ;;  %v191_v3 = vld [vmem:[#allocation7 + $0x218] sm:$0xff] }
  0x28   :  { %45 = vst [vmem:[#allocation3] sm:$0xf] %v712_v0  ;;  %44 = vst [vmem:[#allocation2] sm:$0xf] %v713_v1  ;;  %v123_v4 = vld [vmem:[#allocation7 + $0x8] sm:$0xff]  ;;  %v482_v5 = vpack.c.bf16 %v191_v3, %v189_v2  ;;  %v125_v6 = vld [vmem:[#allocation7 + $0x18] sm:$0xff] }
  0x29   :  { %v188_v7 = vld [vmem:[#allocation7 + $0x200] sm:$0xff]  ;;  %v190_v8 = vld [vmem:[#allocation7 + $0x210] sm:$0xff]  ;;  %v546_v9 = vpack.c.bf16 %v125_v6, %v123_v4  ;;  %v193_v13 = vld [vmem:[#allocation7 + $0x228] sm:$0xff]  ;;  %s717_s1 = smov [#allocation9]  }
  0x2a   :  { %v484_v10 = vpack.c.bf16 %v190_v8, %v188_v7  ;;  %v122_v11 = vld [vmem:[#allocation7] sm:$0xff]  ;;  %v124_v12 = vld [vmem:[#allocation7 + $0x10] sm:$0xff]  ;;  %483 = vmatprep.subr.bf16.mxu1 %v482_v5  ;;  %v195_v15 = vld [vmem:[#allocation7 + $0x238] sm:$0xff]  ;;  %s466_s8 = sshll.u32 %s717_s1, 4  ;;  %s467_s8 = int_to_ptr.vmem [resolvable:$true] %s466_s8 }
  0x2b   :  { %v548_v14 = vpack.c.bf16 %v124_v12, %v122_v11  ;;  %v127_v16 = vld [vmem:[#allocation7 + $0x28] sm:$0xff]  ;;  %v129_v17 = vld [vmem:[#allocation7 + $0x38] sm:$0xff]  ;;  %547 = vmatprep.subr.bf16.mxu0 %v546_v9  ;;  %v486_v18 = vpack.c.bf16 %v195_v15, %v193_v13  ;;  %v192_v20 = vld [vmem:[#allocation7 + $0x220] sm:$0xff]  ;;  %s678_s9 = scalar_lea.vmem %s467_s8, 64  ;;  %p683_p3 = scmp.lt.s32.totalorder %s467_s8, %s467_s8 }
  0x2c   :  { %485 = vmatpush1.bf16.msra.mxu1 %v484_v10  ;;  %v550_v19 = vpack.c.bf16 %v129_v17, %v127_v16  ;;  %v194_v21 = vld [vmem:[#allocation7 + $0x230] sm:$0xff]  ;;  %v126_v22 = vld [vmem:[#allocation7 + $0x20] sm:$0xff]  ;;  %v197_v25 = vld [vmem:[#allocation7 + $0x248] sm:$0xff]  ;;  %p679_p2 = scmp.ne.s32.totalorder %s467_s8, %s678_s9  ;;  %p684_p4 = scmp.lt.s32.totalorder %s678_s9, %s678_s9 }
  0x2d   :  { %549 = vmatpush1.bf16.msra.mxu0 %v548_v14  ;;  %v488_v23 = vpack.c.bf16 %v194_v21, %v192_v20  ;;  %v128_v24 = vld [vmem:[#allocation7 + $0x30] sm:$0xff]  ;;  %v199_v26 = vld [vmem:[#allocation7 + $0x258] sm:$0xff]  ;;  %487 = vmatprep.subr.bf16.mxu1 %v486_v18  ;;  %v131_v29 = vld [vmem:[#allocation7 + $0x48] sm:$0xff] }
  0x2e   :  { %551 = vmatprep.subr.bf16.mxu0 %v550_v19  ;;  %v552_v27 = vpack.c.bf16 %v128_v24, %v126_v22  ;;  %v490_v28 = vpack.c.bf16 %v199_v26, %v197_v25  ;;  %v133_v30 = vld [vmem:[#allocation7 + $0x58] sm:$0xff]  ;;  %v196_v31 = vld [vmem:[#allocation7 + $0x240] sm:$0xff]  ;;  %v198_v33 = vld [vmem:[#allocation7 + $0x250] sm:$0xff]  ;;  %p685_p5 = por %p684_p4, %p683_p3 }
  0x2f   :  { %v554_v32 = vpack.c.bf16 %v133_v30, %v131_v29  ;;  %v130_v34 = vld [vmem:[#allocation7 + $0x40] sm:$0xff]  ;;  %v132_v35 = vld [vmem:[#allocation7 + $0x50] sm:$0xff]  ;;  %v492_v36 = vpack.c.bf16 %v198_v33, %v196_v31  ;;  %v201_v37 = vld [vmem:[#allocation7 + $0x268] sm:$0xff] }
  0x30   :  { %489 = vmatpush1.bf16.msra.mxu1 %v488_v23  ;;  %v203_v38 = vld [vmem:[#allocation7 + $0x278] sm:$0xff]  ;;  %v135_v39 = vld [vmem:[#allocation7 + $0x68] sm:$0xff]  ;;  %v556_v40 = vpack.c.bf16 %v132_v35, %v130_v34  ;;  %v200_v43 = vld [vmem:[#allocation7 + $0x260] sm:$0xff]  ;;  %p686_p6 = pnand %p685_p5, %p679_p2 }
  0x31   :  { %553 = vmatpush1.bf16.msra.mxu0 %v552_v27  ;;  %491 = vmatprep.subr.bf16.mxu1 %v490_v28  ;;  %v494_v41 = vpack.c.bf16 %v203_v38, %v201_v37  ;;  %v137_v42 = vld [vmem:[#allocation7 + $0x78] sm:$0xff]  ;;  %v202_v44 = vld [vmem:[#allocation7 + $0x270] sm:$0xff]  ;;  %v134_v46 = vld [vmem:[#allocation7 + $0x60] sm:$0xff] }
  0x32   :  { %555 = vmatprep.subr.bf16.mxu0 %v554_v32  ;;  %v558_v45 = vpack.c.bf16 %v137_v42, %v135_v39  ;;  %v136_v47 = vld [vmem:[#allocation7 + $0x70] sm:$0xff]  ;;  %v205_v48 = vld [vmem:[#allocation7 + $0x288] sm:$0xff]  ;;  %v207_v49 = vld [vmem:[#allocation7 + $0x298] sm:$0xff]  ;;  %v496_v52 = vpack.c.bf16 %v202_v44, %v200_v43 }
  0x33   :  { %v139_v50 = vld [vmem:[#allocation7 + $0x88] sm:$0xff]  ;;  %v141_v51 = vld [vmem:[#allocation7 + $0x98] sm:$0xff]  ;;  %v560_v53 = vpack.c.bf16 %v136_v47, %v134_v46  ;;  %v498_v54 = vpack.c.bf16 %v207_v49, %v205_v48  ;;  %v204_v55 = vld [vmem:[#allocation7 + $0x280] sm:$0xff] }
  0x34   :  { %493 = vmatpush1.bf16.msra.mxu1 %v492_v36  ;;  %v206_v56 = vld [vmem:[#allocation7 + $0x290] sm:$0xff]  ;;  %v138_v57 = vld [vmem:[#allocation7 + $0x80] sm:$0xff]  ;;  %v562_v58 = vpack.c.bf16 %v141_v51, %v139_v50  ;;  %v209_v60 = vld [vmem:[#allocation7 + $0x2a8] sm:$0xff] }
  0x35   :  { %557 = vmatpush1.bf16.msra.mxu0 %v556_v40  ;;  %495 = vmatprep.subr.bf16.mxu1 %v494_v41  ;;  %v140_v59 = vld [vmem:[#allocation7 + $0x90] sm:$0xff]  ;;  %v211_v61 = vld [vmem:[#allocation7 + $0x2b8] sm:$0xff]  ;;  %v143_v62 = vld [vmem:[#allocation7 + $0xa8] sm:$0xff]  ;;  %v500_v0 = vpack.c.bf16 %v206_v56, %v204_v55 }
  0x36   :  { %559 = vmatprep.subr.bf16.mxu0 %v558_v45  ;;  %v145_v63 = vld [vmem:[#allocation7 + $0xb8] sm:$0xff]  ;;  %v564_v1 = vpack.c.bf16 %v140_v59, %v138_v57  ;;  %v502_v2 = vpack.c.bf16 %v211_v61, %v209_v60  ;;  %v208_v3 = vld [vmem:[#allocation7 + $0x2a0] sm:$0xff]  ;;  %v210_v4 = vld [vmem:[#allocation7 + $0x2b0] sm:$0xff]  ;;  %v57_v60 = vlaneseq }
  0x37   :  { %v142_v5 = vld [vmem:[#allocation7 + $0xa0] sm:$0xff]  ;;  %v566_v6 = vpack.c.bf16 %v145_v63, %v143_v62  ;;  %v144_v7 = vld [vmem:[#allocation7 + $0xb0] sm:$0xff]  ;;  %v213_v8 = vld [vmem:[#allocation7 + $0x2c8] sm:$0xff]  ;;  %v504_v12 = vpack.c.bf16 %v210_v4, %v208_v3 }
  0x38   :  { %497 = vmatpush1.bf16.msra.mxu1 %v496_v52  ;;  %v215_v9 = vld [vmem:[#allocation7 + $0x2d8] sm:$0xff]  ;;  %v147_v10 = vld [vmem:[#allocation7 + $0xc8] sm:$0xff]  ;;  %v568_v13 = vpack.c.bf16 %v144_v7, %v142_v5  ;;  %v212_v15 = vld [vmem:[#allocation7 + $0x2c0] sm:$0xff]  ;;  %vm457_vm0 = vcmp.lt.s32.totalorder %v57_v60, 256 }
  0x39   :  { %561 = vmatpush1.bf16.msra.mxu0 %v560_v53  ;;  %499 = vmatprep.subr.bf16.mxu1 %v498_v54  ;;  %v149_v11 = vld [vmem:[#allocation7 + $0xd8] sm:$0xff]  ;;  %v506_v14 = vpack.c.bf16 %v215_v9, %v213_v8  ;;  %v214_v16 = vld [vmem:[#allocation7 + $0x2d0] sm:$0xff]  ;;  %v146_v17 = vld [vmem:[#allocation7 + $0xc0] sm:$0xff] }
  0x3a   :  { %563 = vmatprep.subr.bf16.mxu0 %v562_v58  ;;  %v570_v18 = vpack.c.bf16 %v149_v11, %v147_v10  ;;  %v148_v19 = vld [vmem:[#allocation7 + $0xd0] sm:$0xff]  ;;  %v217_v20 = vld [vmem:[#allocation7 + $0x2e8] sm:$0xff]  ;;  %v219_v21 = vld [vmem:[#allocation7 + $0x2f8] sm:$0xff]  ;;  %v508_v24 = vpack.c.bf16 %v214_v16, %v212_v15  ;;  %v714_v58 = vmov 1935823168   ;;  %v760_v10 = vshrl.u32 %v57_v60, 7 }
  0x3b   :  { %v151_v22 = vld [vmem:[#allocation7 + $0xe8] sm:$0xff]  ;;  %v153_v23 = vld [vmem:[#allocation7 + $0xf8] sm:$0xff]  ;;  %v572_v25 = vpack.c.bf16 %v148_v19, %v146_v17  ;;  %v510_v26 = vpack.c.bf16 %v219_v21, %v217_v20  ;;  %v216_v27 = vld [vmem:[#allocation7 + $0x2e0] sm:$0xff]  ;;  %v55_v59 = vunpack.c.l.s4 %v714_v58 }
  0x3c   :  { %501 = vmatpush1.bf16.msra.mxu1 %v500_v0  ;;  %v218_v28 = vld [vmem:[#allocation7 + $0x2f0] sm:$0xff]  ;;  %v150_v29 = vld [vmem:[#allocation7 + $0xe0] sm:$0xff]  ;;  %v574_v30 = vpack.c.bf16 %v153_v23, %v151_v22  ;;  %v221_v32 = vld [vmem:[#allocation7 + $0x308] sm:$0xff] }
  0x3d   :  { %565 = vmatpush1.bf16.msra.mxu0 %v564_v1  ;;  %503 = vmatprep.subr.bf16.mxu1 %v502_v2  ;;  %v152_v31 = vld [vmem:[#allocation7 + $0xf0] sm:$0xff]  ;;  %v223_v33 = vld [vmem:[#allocation7 + $0x318] sm:$0xff]  ;;  %v155_v34 = vld [vmem:[#allocation7 + $0x108] sm:$0xff]  ;;  %v512_v36 = vpack.c.bf16 %v218_v28, %v216_v27  ;;  %v56_v9 = vunpack.c.0.s8 %v55_v59 }
  0x3e   :  { %567 = vmatprep.subr.bf16.mxu0 %v566_v6  ;;  %v157_v35 = vld [vmem:[#allocation7 + $0x118] sm:$0xff]  ;;  %v576_v37 = vpack.c.bf16 %v152_v31, %v150_v29  ;;  %v514_v38 = vpack.c.bf16 %v223_v33, %v221_v32  ;;  %v220_v39 = vld [vmem:[#allocation7 + $0x300] sm:$0xff]  ;;  %v222_v40 = vld [vmem:[#allocation7 + $0x310] sm:$0xff] }
  0x3f   :  { %v154_v41 = vld [vmem:[#allocation7 + $0x100] sm:$0xff]  ;;  %v578_v42 = vpack.c.bf16 %v157_v35, %v155_v34  ;;  %v156_v43 = vld [vmem:[#allocation7 + $0x110] sm:$0xff]  ;;  %v225_v44 = vld [vmem:[#allocation7 + $0x328] sm:$0xff]  ;;  %v516_v48 = vpack.c.bf16 %v222_v40, %v220_v39 }
  0x40   :  { %505 = vmatpush1.bf16.msra.mxu1 %v504_v12  ;;  %v227_v45 = vld [vmem:[#allocation7 + $0x338] sm:$0xff]  ;;  %v159_v46 = vld [vmem:[#allocation7 + $0x128] sm:$0xff]  ;;  %v580_v49 = vpack.c.bf16 %v156_v43, %v154_v41  ;;  %v224_v51 = vld [vmem:[#allocation7 + $0x320] sm:$0xff] }
  0x41   :  { %569 = vmatpush1.bf16.msra.mxu0 %v568_v13  ;;  %507 = vmatprep.subr.bf16.mxu1 %v506_v14  ;;  %v161_v47 = vld [vmem:[#allocation7 + $0x138] sm:$0xff]  ;;  %v518_v50 = vpack.c.bf16 %v227_v45, %v225_v44  ;;  %v226_v52 = vld [vmem:[#allocation7 + $0x330] sm:$0xff]  ;;  %v158_v53 = vld [vmem:[#allocation7 + $0x120] sm:$0xff] }
  0x42   :  { %571 = vmatprep.subr.bf16.mxu0 %v570_v18  ;;  %v582_v54 = vpack.c.bf16 %v161_v47, %v159_v46  ;;  %v160_v55 = vld [vmem:[#allocation7 + $0x130] sm:$0xff]  ;;  %v229_v56 = vld [vmem:[#allocation7 + $0x348] sm:$0xff]  ;;  %v231_v57 = vld [vmem:[#allocation7 + $0x358] sm:$0xff]  ;;  %v520_v63 = vpack.c.bf16 %v226_v52, %v224_v51 }
  0x43   :  { %v163_v61 = vld [vmem:[#allocation7 + $0x148] sm:$0xff]  ;;  %v165_v62 = vld [vmem:[#allocation7 + $0x158] sm:$0xff]  ;;  %v584_v0 = vpack.c.bf16 %v160_v55, %v158_v53  ;;  %v522_v1 = vpack.c.bf16 %v231_v57, %v229_v56  ;;  %v228_v2 = vld [vmem:[#allocation7 + $0x340] sm:$0xff] }
  0x44   :  { %509 = vmatpush1.bf16.msra.mxu1 %v508_v24  ;;  %v230_v3 = vld [vmem:[#allocation7 + $0x350] sm:$0xff]  ;;  %v162_v4 = vld [vmem:[#allocation7 + $0x140] sm:$0xff]  ;;  %v586_v5 = vpack.c.bf16 %v165_v62, %v163_v61  ;;  %v233_v7 = vld [vmem:[#allocation7 + $0x368] sm:$0xff] }
  0x45   :  { %573 = vmatpush1.bf16.msra.mxu0 %v572_v25  ;;  %511 = vmatprep.subr.bf16.mxu1 %v510_v26  ;;  %v164_v6 = vld [vmem:[#allocation7 + $0x150] sm:$0xff]  ;;  %v235_v8 = vld [vmem:[#allocation7 + $0x378] sm:$0xff]  ;;  %v167_v11 = vld [vmem:[#allocation7 + $0x168] sm:$0xff]  ;;  %v524_v13 = vpack.c.bf16 %v230_v3, %v228_v2  ;;  %v59_v25 = vsub.s32 %v56_v9, %v760_v10 }
  0x46   :  { %575 = vmatprep.subr.bf16.mxu0 %v574_v30  ;;  %v169_v12 = vld [vmem:[#allocation7 + $0x178] sm:$0xff]  ;;  %v232_v14 = vld [vmem:[#allocation7 + $0x360] sm:$0xff]  ;;  %v234_v15 = vld [vmem:[#allocation7 + $0x370] sm:$0xff]  ;;  %v588_v16 = vpack.c.bf16 %v164_v6, %v162_v4  ;;  %v526_v17 = vpack.c.bf16 %v235_v8, %v233_v7 }
  0x47   :  { %v166_v18 = vld [vmem:[#allocation7 + $0x160] sm:$0xff]  ;;  %v168_v19 = vld [vmem:[#allocation7 + $0x170] sm:$0xff]  ;;  %v237_v20 = vld [vmem:[#allocation7 + $0x388] sm:$0xff]  ;;  %v590_v21 = vpack.c.bf16 %v169_v12, %v167_v11  ;;  %v528_v31 = vpack.c.bf16 %v234_v15, %v232_v14 }
  0x48   :  { %513 = vmatpush1.bf16.msra.mxu1 %v512_v36  ;;  %v239_v22 = vld [vmem:[#allocation7 + $0x398] sm:$0xff]  ;;  %v171_v23 = vld [vmem:[#allocation7 + $0x188] sm:$0xff]  ;;  %v236_v26 = vld [vmem:[#allocation7 + $0x380] sm:$0xff]  ;;  %v592_v39 = vpack.c.bf16 %v168_v19, %v166_v18 }
  0x49   :  { %577 = vmatpush1.bf16.msra.mxu0 %v576_v37  ;;  %515 = vmatprep.subr.bf16.mxu1 %v514_v38  ;;  %v173_v24 = vld [vmem:[#allocation7 + $0x198] sm:$0xff]  ;;  %v238_v27 = vld [vmem:[#allocation7 + $0x390] sm:$0xff]  ;;  %v47_v28 = vld [vmem:[#allocation3] sm:$0xf]  ;;  %v530_v40 = vpack.c.bf16 %v239_v22, %v237_v20 }
  0x4a   :  { %579 = vmatprep.subr.bf16.mxu0 %v578_v42  ;;  %v48_v29 = vld [vmem:[#allocation4] ss:$4 sm:$0x3]  ;;  %v50_v30 = vld [vmem:[#allocation4 + $0x8] ss:$4 sm:$0x3]  ;;  %v594_v44 = vpack.c.bf16 %v173_v24, %v171_v23 }
  0x4b   :  { %v170_v32 = vld [vmem:[#allocation7 + $0x180] sm:$0xff]  ;;  %v172_v33 = vld [vmem:[#allocation7 + $0x190] sm:$0xff]  ;;  %v241_v34 = vld [vmem:[#allocation7 + $0x3a8] sm:$0xff]  ;;  %v53_v36 = vcombine.low %v48_v29, %v50_v30  ;;  %v715_v24 = vmov 1983009808  }
  0x4c   :  { %517 = vmatpush1.bf16.msra.mxu1 %v516_v48  ;;  %v243_v35 = vld [vmem:[#allocation7 + $0x3b8] sm:$0xff]  ;;  %v65_v37 = vld [vmem:[#allocation4 + $0x1] ss:$4 sm:$0x3]  ;;  %v46_v53 = vld [vmem:[#allocation2] sm:$0xf]  ;;  %v596_v58 = vpack.c.bf16 %v172_v33, %v170_v32 }
  0x4d   :  { %581 = vmatpush1.bf16.msra.mxu0 %v580_v49  ;;  %519 = vmatprep.subr.bf16.mxu1 %v518_v50  ;;  %v67_v38 = vld [vmem:[#allocation4 + $0x9] ss:$4 sm:$0x3]  ;;  %v82_v42 = vld [vmem:[#allocation4 + $0x2] ss:$4 sm:$0x3]  ;;  %v60_v45 = vrot.slane %v53_v36, %v59_v25  ;;  %v534_v59 = vpack.c.bf16 %v243_v35, %v241_v34 }
  0x4e   :  { %583 = vmatprep.subr.bf16.mxu0 %v582_v54  ;;  %v70_v41 = vcombine.low %v65_v37, %v67_v38  ;;  %v84_v43 = vld [vmem:[#allocation4 + $0xa] ss:$4 sm:$0x3]  ;;  %v99_v47 = vld [vmem:[#allocation4 + $0x3] ss:$4 sm:$0x3]  ;;  %v532_v54 = vpack.c.bf16 %v238_v27, %v236_v26 }
  0x4f   :  { %v87_v46 = vcombine.low %v82_v42, %v84_v43  ;;  %v101_v48 = vld [vmem:[#allocation4 + $0xb] ss:$4 sm:$0x3]  ;;  %v175_v49 = vld [vmem:[#allocation7 + $0x1a8] sm:$0xff]  ;;  %v63_v55 = vmax.f32 %v47_v28, %v60_v45  ;;  %v62_v57 = vadd.f32 %v60_v45, %v46_v53  ;;  %v240_v61 = vld [vmem:[#allocation7 + $0x3a0] sm:$0xff] }
  0x50   :  { %521 = vmatpush1.bf16.msra.mxu1 %v520_v63  ;;  %v177_v50 = vld [vmem:[#allocation7 + $0x1b8] sm:$0xff]  ;;  %v77_v51 = vrot.slane %v70_v41, %v59_v25  ;;  %v104_v52 = vcombine.low %v99_v47, %v101_v48  ;;  %v242_v62 = vld [vmem:[#allocation7 + $0x3b0] sm:$0xff]  ;;  %v174_v63 = vld [vmem:[#allocation7 + $0x1a0] sm:$0xff] }
  0x51   :  { %585 = vmatpush1.bf16.msra.mxu0 %v584_v0  ;;  %523 = vmatprep.subr.bf16.mxu1 %v522_v1  ;;  %v94_v56 = vrot.slane %v87_v46, %v59_v25  ;;  %v598_v0 = vpack.c.bf16 %v177_v50, %v175_v49  ;;  %v176_v1 = vld [vmem:[#allocation7 + $0x1b0] sm:$0xff]  ;;  %v245_v2 = vld [vmem:[#allocation7 + $0x3c8] sm:$0xff]  ;;  %v247_v3 = vld [vmem:[#allocation7 + $0x3d8] sm:$0xff]  ;;  %v536_v9 = vpack.c.bf16 %v242_v62, %v240_v61 }
  0x52   :  { %587 = vmatprep.subr.bf16.mxu0 %v586_v5  ;;  %v80_v4 = vmax.f32 %v63_v55, %v77_v51  ;;  %v111_v5 = vrot.slane %v104_v52, %v59_v25  ;;  %v79_v6 = vadd.f32 %v77_v51, %v62_v57  ;;  %v179_v7 = vld [vmem:[#allocation7 + $0x1c8] sm:$0xff]  ;;  %v181_v8 = vld [vmem:[#allocation7 + $0x1d8] sm:$0xff]  ;;  %v538_v14 = vpack.c.bf16 %v247_v3, %v245_v2  ;;  %v244_v15 = vld [vmem:[#allocation7 + $0x3c0] sm:$0xff] }
  0x53   :  { %v602_v18 = vpack.c.bf16 %v181_v8, %v179_v7  ;;  %v180_v19 = vld [vmem:[#allocation7 + $0x1d0] sm:$0xff]  ;;  %v249_v20 = vld [vmem:[#allocation7 + $0x3e8] sm:$0xff]  ;;  %v336_v25 = vunpack.c.l.s4 %v715_v24  ;;  %v185_v27 = vld [vmem:[#allocation7 + $0x1f8] sm:$0xff] }
  0x54   :  { %525 = vmatpush1.bf16.msra.mxu1 %v524_v13  ;;  %v97_v11 = vmax.f32 %v80_v4, %v94_v56  ;;  %v96_v12 = vadd.f32 %v94_v56, %v79_v6  ;;  %v600_v13 = vpack.c.bf16 %v176_v1, %v174_v63  ;;  %v183_v26 = vld [vmem:[#allocation7 + $0x1e8] sm:$0xff]  ;;  %v250_v32 = vld [vmem:[#allocation7 + $0x3f0] sm:$0xff]  ;;  %v182_v34 = vld [vmem:[#allocation7 + $0x1e0] sm:$0xff] }
  0x55   :  { %589 = vmatpush1.bf16.msra.mxu0 %v588_v16  ;;  %527 = vmatprep.subr.bf16.mxu1 %v526_v17  ;;  %v246_v16 = vld [vmem:[#allocation7 + $0x3d0] sm:$0xff]  ;;  %v178_v17 = vld [vmem:[#allocation7 + $0x1c0] sm:$0xff]  ;;  %v606_v33 = vpack.c.bf16 %v185_v27, %v183_v26  ;;  %v337_v36 = vunpack.c.0.s8 %v336_v25 }
  0x56   :  { %591 = vmatprep.subr.bf16.mxu0 %v590_v21  ;;  %v251_v21 = vld [vmem:[#allocation7 + $0x3f8] sm:$0xff]  ;;  %v114_v22 = vmax.f32 %v97_v11, %v111_v5  ;;  %v113_v23 = vadd.f32 %v111_v5, %v96_v12  ;;  %v540_v28 = vpack.c.bf16 %v246_v16, %v244_v15  ;;  %v604_v29 = vpack.c.bf16 %v180_v19, %v178_v17  ;;  %v184_v35 = vld [vmem:[#allocation7 + $0x1f0] sm:$0xff] }
  0x57   :  { %v542_v30 = vpack.c.bf16 %v251_v21, %v249_v20  ;;  %v608_v38 = vpack.c.bf16 %v184_v35, %v182_v34 }
  0x58   :  { %529 = vmatpush1.bf16.msra.mxu1 %v528_v31  ;;  %116 = vst [vmem:[#allocation3] sm:$0xf] %v114_v22  ;;  %115 = vst [vmem:[#allocation2] sm:$0xf] %v113_v23  ;;  %v248_v31 = vld [vmem:[#allocation7 + $0x3e0] sm:$0xff] }
  0x59   :  { %593 = vmatpush1.bf16.msra.mxu0 %v592_v39  ;;  %531 = vmatprep.subr.bf16.mxu1 %v530_v40  ;;  %v544_v37 = vpack.c.bf16 %v250_v32, %v248_v31  ;;  %v340_v39 = vsub.s32 %v337_v36, %v760_v10 }
  0x5a   :  { %595 = vmatprep.subr.bf16.mxu0 %v594_v44 }
  0x5c   :  { %533 = vmatpush1.bf16.msra.mxu1 %v532_v54 }
  0x5d   :  { %597 = vmatpush1.bf16.msra.mxu0 %v596_v58  ;;  %535 = vmatprep.subr.bf16.mxu1 %v534_v59  ;;  %v716_v58 = vmov 1966171168  }
  0x5e   :  { %599 = vmatprep.subr.bf16.mxu0 %v598_v0  ;;  %v432_v59 = vunpack.c.l.s4 %v716_v58 }
  0x5f   :  { %v479_v40 = vld.sshfl [vmem:[#allocation3] sm:$0x33 pattern:$0x76325410]  ;;  %v120_v41 = vld [vmem:[#allocation2] sm:$0xf] }
  0x60   :  { %537 = vmatpush1.bf16.msra.mxu1 %v536_v9  ;;  %v260_v42 = vcombine.high %v479_v40, %v479_v40  ;;  %v121_v43 = vmul.f32 0.25, %v120_v41  ;;  %v433_v61 = vunpack.c.0.s8 %v432_v59 }
  0x61   :  { %601 = vmatpush1.bf16.msra.mxu0 %v600_v13  ;;  %539 = vmatprep.subr.bf16.mxu1 %v538_v14 }
  0x62   :  { %603 = vmatprep.subr.bf16.mxu0 %v602_v18  ;;  %327 = vmatprep.mubr.f32.mxu1 %v260_v42  ;;  %v341_v44 = vrot.slane %v121_v43, %v340_v39  ;;  %v436_v63 = vsub.s32 %v433_v61, %v760_v10 }
  0x64   :  { %541 = vmatpush1.bf16.msra.mxu1 %v540_v28  ;;  %v342_v45 = vcombine.high %v341_v44, %v341_v44 }
  0x65   :  { %605 = vmatpush1.bf16.msra.mxu0 %v604_v29  ;;  %543 = vmatprep.subr.bf16.mxu1 %v542_v30 }
  0x66   :  { %607 = vmatprep.subr.bf16.mxu0 %v606_v33  ;;  %409 = vmatprep.mubr.f32.mxu0 %v342_v45 }
  0x68   :  { %545 = vmatpush1.bf16.msra.mxu1 %v544_v37 }
  0x69   :  { %609 = vmatpush1.bf16.msra.mxu0 %v608_v38 }
  0x6b   :  { %328 = vmatmul.mubr.f32.vlgmr.msra.gmra.mrb[0].mxu1 %v479_v40 }
  0x6c   :  { %410 = vmatmul.mubr.f32.vlgmr.msra.gmra.mrb[0].mxu0 %v341_v44 }
 0x13e   :  { %v329_v46 = vpop.f32.mrb[0].mxu1 }
 0x13f   :  { %v331_v47 = vpop.f32.mrb[1].mxu1  ;;  %v411_v48 = vpop.f32.mrb[0].mxu0 }
 0x140   :  { %v412_v49 = vadd.f32 %v411_v48, %v329_v46  ;;  %v413_v50 = vpop.f32.mrb[1].mxu0 }
 0x141   :  { %v414_v51 = vadd.f32 %v413_v50, %v331_v47 }
 0x142   :  { %v480_v52 = vmul.f32 -1.442695, %v412_v49 }
 0x143   :  { %v481_v53 = vmul.f32 -1.442695, %v414_v51 }
 0x144   :  { %626 = vpow2.f32 %v480_v52 }
 0x145   :  { %628 = vpow2.f32 %v481_v53 }
 0x14e   :  { %v627_v54 = vpop.eup %626 }
 0x14f   :  { %v629_v55 = vpop.eup %628  ;;  %v422_v56 = vadd.f32 1.0, %v627_v54 }
 0x150   :  { %v423_v57 = vadd.f32 1.0, %v629_v55 }
 0x151   :  { %630 = vrcp.f32 %v422_v56 }
 0x152   :  { %632 = vrcp.f32 %v423_v57 }
 0x15b   :  { %v631_v62 = vpop.eup %630 }
 0x15c   :  { %v633_v0 = vpop.eup %632 }
 0x15d   :  { %v430_v1 = vcombine.low %v631_v62, %v633_v0 }
 0x15f   :  { %v437_v2 = vrot.slane %v430_v1, %v436_v63 }
 0x161   :  { %v438_v3 = vcombine.high %v437_v2, %v437_v2  ;;  %v445_v4 = vrot.slane %v437_v2, %v436_v63 }
 0x163   :  { %v452_v5 = vrot.slane %v438_v3, %v436_v63  ;;  %459 = vst.msk [vmem:[#allocation9] sm:$0x3] %vm457_vm0, %v445_v4 }
 0x165   :  { %460 = vst.msk [vmem:[#allocation9 + $0x2] sm:$0x3] %vm457_vm0, %v452_v5 }
 0x166   :  { %689 = shalt.err (!%p686_p6)
}
 0x167   :  { %s690_s12 = scalar_lea.hbm %s780_s2, 64 }
 0x168   :  { %p691_p7 = scmp.ne.s32.totalorder %s780_s2, %s690_s12  ;;  %p694_p8 = scmp.lt.u32.totalorder %s690_s12, %s780_s2 }
 0x16a   :  { %p696_p9 = pnand %p694_p8, %p691_p7 }
 0x16c   :  { %699 = shalt.err (!%p696_p9)
}
 0x16d   :  { %s718_s17 = smov 32   ;;  %s719_s18 = smov 2  }
 0x16e   :  { %472 = dma.vmem_to_hbm [thread:$0]  %s467_s8, 64, %s780_s2, [#allocation6], %s718_s17, %s718_s17, %s719_s18  }
 0x16f   :  { %704 = dma.done.wait [#allocation6], 64  }
 0x170   :  { %705 = vsyncadd [#allocation6], 4294967232 }
 0x171   :  { %476 = vsyncpa [#allocation5], 1 }
 0x172   :  { %477 = vsyncpa [#allocation8], 1 }
 0x173   :  { %478 = vsyncpa [#allocation6], 1 }

</bundles_post_ra>
